<compile_context>
chip_gen: v5e
topology: v5e:2x2
jax: 0.10.0
libtpu: 0.0.40
codegen_flags: <defaults>
</compile_context>

<pallas_src>
import functools

import jax
import jax.numpy as jnp
from jax.experimental import pallas as pl
from jax.experimental.pallas import tpu as pltpu

BN_EPS = 1e-5
LANE = 128
HID1, HID2, HID3 = 512, 128, 64      # PyTorch layer widths
HID3_PAD = 128                        # layer_3 output padded 64 -> 128
NEG_BIG = -1e30                       # finite "-inf" folded into padded b4 cols


def _round_up(x, m):
    return ((x + m - 1) // m) * m


def _cdiv(a, b):
    return -(-a // b)


# ----------------------------------------------------------------------------
# Kernel
# ----------------------------------------------------------------------------
def _make_mlp_kernel(loss_type):
    def kernel(x_ref, w1_ref, b1_ref, w2_ref, b2_ref, w3_ref, b3_ref,
               w4_ref, b4_ref, out_ref):
        def linear_relu(h, w_ref, b_ref):
            # BatchNorm folded into (w, b). bf16 x bf16 on the MXU, f32 acc,
            # f32 bias-add + ReLU on the VPU, result re-packed to bf16 (the
            # next matmul consumes bf16 anyway).
            z = jnp.dot(h, w_ref[...], preferred_element_type=jnp.float32)
            return jnp.maximum(z + b_ref[...], 0.0).astype(jnp.bfloat16)

        h = x_ref[...]                       # bf16, pre-cast in the wrapper
        h = linear_relu(h, w1_ref, b1_ref)   # layer_1 + batchnorm1 (folded) + relu
        h = linear_relu(h, w2_ref, b2_ref)   # layer_2 + batchnorm2 (folded) + relu
        # dropout(p=0.2): identity in eval/inference mode
        h = linear_relu(h, w3_ref, b3_ref)   # layer_3 + batchnorm3 (folded) + relu
        # dropout(p=0.2): identity in eval/inference mode
        logits = jnp.dot(h, w4_ref[...],
                         preferred_element_type=jnp.float32) + b4_ref[...]
        # Padded class columns already carry a -1e30 bias (folded at prep
        # time), so no iota/where masking is needed in the epilogue.

        if loss_type == 'NEGATIVE_LOG_LIKELIHOOD':        # LogSoftmax(dim=1)
            m = jnp.max(logits, axis=-1, keepdims=True)
            s = logits - m
            lse = jnp.log(jnp.sum(jnp.exp(s), axis=-1, keepdims=True))
            out_ref[...] = (s - lse).astype(out_ref.dtype)
        elif loss_type == 'BCE':                          # Sigmoid
            out_ref[...] = jax.nn.sigmoid(logits).astype(out_ref.dtype)
        else:                                             # raw logits
            out_ref[...] = logits.astype(out_ref.dtype)

    return kernel


# ----------------------------------------------------------------------------
# Wrapper
# ----------------------------------------------------------------------------
def multiclass_classification_forward(x, prepped, num_class, loss_type,
                                      tile_b=1024):
    """x: [N, num_feature] (any float dtype); prepped: output of prepare_params().
    Returns [N, num_class] f32."""
    (w1, b1, w2, b2, w3, b3, w4, b4) = prepped
    n, f = x.shape
    out_pad = w4.shape[1]

    # Balanced batch tiles, multiples of 16 (dense bf16 sublane packing), and
    # >= 2 grid steps when n >= 32 so the "parallel" axis can be split across
    # both TensorCores on v7x instead of pinning all work on one core.
    n_tiles = max(_cdiv(n, int(tile_b)), 1)
    if n >= 32:
        n_tiles = max(n_tiles, 2)
    tb = _round_up(_cdiv(n, n_tiles), 16)
    tb = min(tb, _round_up(n, 16))
    n_pad = _round_up(n, tb)
    grid = (n_pad // tb,)

    x = x.astype(jnp.bfloat16)            # halve the x HBM read + VMEM tile
    if n_pad != n:
        x = jnp.pad(x, ((0, n_pad - n), (0, 0)))

    x_spec = pl.BlockSpec((tb, f), lambda i: (i, 0))
    out_spec = pl.BlockSpec((tb, out_pad), lambda i: (i, 0))

    def resident(shape):                  # VMEM-resident across grid steps
        return pl.BlockSpec(shape, lambda i: (0, 0))

    in_specs = [x_spec,
                resident(w1.shape), resident(b1.shape),
                resident(w2.shape), resident(b2.shape),
                resident(w3.shape), resident(b3.shape),
                resident(w4.shape), resident(b4.shape)]

    # VMEM budget: double-buffered bf16 x/out tiles + (conservatively
    # double-buffered) resident weights + live intermediates, with headroom.
    # Clamp is generation-aware: ~40 MiB on 64 MiB-VMEM parts (v7x), up to
    # 96 MiB on 128 MiB parts (v5e/v6e).
    w_bytes = sum(int(a.size) * a.dtype.itemsize for a in prepped)
    io_bytes = 2 * tb * f * 2 + 2 * tb * out_pad * 2
    inter_bytes = tb * (HID1 + HID2 + HID3_PAD + out_pad) * 6   # f32 z + bf16 h
    need = 2 * w_bytes + io_bytes + inter_bytes + (4 << 20)
    try:
        phys_vmem = int(pltpu.get_tpu_info().vmem_capacity_bytes)
    except Exception:
        phys_vmem = 128 << 20
    vmem_cap = (40 << 20) if phys_vmem <= (64 << 20) else (96 << 20)
    vmem_limit = int(min(max(need, 16 << 20), vmem_cap))

    flops = 2 * n_pad * (f * HID1 + HID1 * HID2 + HID2 * HID3_PAD
                         + HID3_PAD * out_pad)
    transcendentals = n_pad * out_pad if loss_type in (
        'NEGATIVE_LOG_LIKELIHOOD', 'BCE') else 0
    bytes_accessed = (int(x.size) * 2 + w_bytes + n_pad * out_pad * 2)

    # NOTE: for very large num_feature, W1 / the x tile could exceed the VMEM
    # budget; then add a second ("arbitrary") grid axis over K for layer 1
    # with an f32 accumulator scratch. Not needed at these sizes.
    out = pl.pallas_call(
        _make_mlp_kernel(loss_type),
        out_shape=jax.ShapeDtypeStruct((n_pad, out_pad), jnp.bfloat16),
        grid=grid,
        in_specs=in_specs,
        out_specs=out_spec,
        compiler_params=pltpu.CompilerParams(
            dimension_semantics=("parallel",),
            vmem_limit_bytes=vmem_limit),
        cost_estimate=pl.CostEstimate(flops=int(flops),
                                      transcendentals=int(transcendentals),
                                      bytes_accessed=int(bytes_accessed)),
    )(x, w1, b1, w2, b2, w3, b3, w4, b4)

    # Small fused slice + up-cast; padded rows/columns are dropped here.
    return out[:n, :num_class].astype(jnp.float32)


# ----------------------------------------------------------------------------
# Parameters (synthetic, PyTorch layout) + inference-time prep
# ----------------------------------------------------------------------------
def init_raw_params(key, num_feature, num_class):
    """Deterministic synthetic parameters in PyTorch layout (Linear: [out, in])."""
    dims = [(num_feature, HID1), (HID1, HID2), (HID2, HID3), (HID3, num_class)]
    keys = iter(jax.random.split(key, 20))
    layers = []
    for li, (fin, fout) in enumerate(dims):
        layer = {
            'w': jax.random.normal(next(keys), (fout, fin), jnp.float32) * 0.05,
            'b': jax.random.normal(next(keys), (fout,), jnp.float32) * 0.05,
        }
        if li < 3:   # BatchNorm1d follows the first three Linears
            layer['gamma'] = 1.0 + 0.1 * jax.random.normal(next(keys), (fout,), jnp.float32)
            layer['beta'] = 0.1 * jax.random.normal(next(keys), (fout,), jnp.float32)
            layer['mean'] = 0.1 * jax.random.normal(next(keys), (fout,), jnp.float32)
            layer['var'] = 0.5 + jax.random.uniform(next(keys), (fout,), jnp.float32)
        layers.append(layer)
    return layers


def prepare_params(raw, num_class, weight_dtype=jnp.bfloat16):
    """Fold BatchNorm into the preceding Linear, pad widths to 128 lanes,
    transpose to [in, out], cast weights to `weight_dtype` (biases stay f32).
    Padded output-class bias entries are set to -1e30 so no masking is needed
    in the kernel epilogue."""
    out_pad = _round_up(num_class, LANE)

    def fold(layer):
        scale = layer['gamma'] / jnp.sqrt(layer['var'] + BN_EPS)
        w = layer['w'].T * scale[None, :]                          # [in, out]
        b = (layer['b'] - layer['mean']) * scale + layer['beta']
        return w, b

    w1, b1 = fold(raw[0])
    w2, b2 = fold(raw[1])
    w3, b3 = fold(raw[2])
    # pad layer_3 output 64 -> 128 with zeros (ReLU keeps padded cols at exactly 0)
    w3 = jnp.pad(w3, ((0, 0), (0, HID3_PAD - HID3)))
    b3 = jnp.pad(b3, (0, HID3_PAD - HID3))
    # layer_out: pad input 64 -> 128 (zeros) and output num_class -> out_pad;
    # padded class columns get a large-negative bias (mask folded into b4).
    w4 = jnp.pad(raw[3]['w'].T, ((0, HID3_PAD - HID3), (0, out_pad - num_class)))
    b4 = jnp.pad(raw[3]['b'], (0, out_pad - num_class), constant_values=NEG_BIG)

    def pack(w, b):
        return w.astype(weight_dtype), b.astype(jnp.float32).reshape(1, -1)

    return (*pack(w1, b1), *pack(w2, b2), *pack(w3, b3), *pack(w4, b4))


# ----------------------------------------------------------------------------
# Pure-JAX references
# ----------------------------------------------------------------------------
def reference_forward(x, raw, loss_type):
    """f32 reference of the PyTorch eval-mode forward (BN not folded)."""
    P = jax.lax.Precision.HIGHEST

    def lin(h, layer):
        return jnp.dot(h, layer['w'].T, precision=P) + layer['b']

    def bn(h, layer):
        return ((h - layer['mean']) / jnp.sqrt(layer['var'] + BN_EPS)
                * layer['gamma'] + layer['beta'])

    h = x
    for li in range(3):
        h = jnp.maximum(bn(lin(h, raw[li]), raw[li]), 0.0)
        # dropout(p=0.2) after layers 2 & 3 is identity in eval mode
    logits = lin(h, raw[3])
    if loss_type == 'NEGATIVE_LOG_LIKELIHOOD':
        return jax.nn.log_softmax(logits, axis=1)
    if loss_type == 'BCE':
        return jax.nn.sigmoid(logits)
    return logits


def reference_prepped(x, prepped, num_class, loss_type):
    """Emulation of exactly the folded / padded / bf16 math the kernel
    performs (tight structural correctness check)."""
    (w1, b1, w2, b2, w3, b3, w4, b4) = prepped
    P = jax.lax.Precision.HIGHEST

    def dot(h, w):
        return jnp.dot(h.astype(jnp.float32), w.astype(jnp.float32), precision=P)

    h = x.astype(jnp.bfloat16)
    h = jnp.maximum(dot(h, w1) + b1, 0.0).astype(jnp.bfloat16)
    h = jnp.maximum(dot(h, w2) + b2, 0.0).astype(jnp.bfloat16)
    h = jnp.maximum(dot(h, w3) + b3, 0.0).astype(jnp.bfloat16)
    logits = dot(h, w4) + b4
    if loss_type == 'NEGATIVE_LOG_LIKELIHOOD':
        out = jax.nn.log_softmax(logits, axis=1)
    elif loss_type == 'BCE':
        out = jax.nn.sigmoid(logits)
    else:
        out = logits
    return out.astype(jnp.bfloat16).astype(jnp.float32)[:, :num_class]


# ----------------------------------------------------------------------------
if __name__ == "__main__":
    num_feature, num_class, batch = 32, 10, 8
    loss_type = 'NEGATIVE_LOG_LIKELIHOOD'   # output of classifier is LogSoftmax

    key = jax.random.PRNGKey(0)
    kx, kp = jax.random.split(key)
    x = jax.random.normal(kx, (batch, num_feature), jnp.float32)
    raw = init_raw_params(kp, num_feature, num_class)
    prepped = prepare_params(raw, num_class, weight_dtype=jnp.bfloat16)

    fwd = jax.jit(functools.partial(multiclass_classification_forward,
                                    num_class=num_class, loss_type=loss_type))
    out = fwd(x, prepped)
    jax.block_until_ready(out)
    assert out.shape == (batch, num_class)
    assert out.dtype == jnp.float32

    # tight check: same folded / padded / bf16 math, pure JAX
    ref_q = reference_prepped(x, prepped, num_class, loss_type)
    assert jnp.allclose(out, ref_q, rtol=2e-2, atol=2e-2), \
        "mismatch vs folded/bf16 reference"

    # semantic check vs the f32 PyTorch eval-mode forward (bf16 noise only)
    ref = reference_forward(x, raw, loss_type)
    assert jnp.allclose(out, ref, rtol=1e-1, atol=1e-1), \
        "mismatch vs f32 module reference"

    print("KERNEL_OK")
</pallas_src>

<mosaic_0001>
module attributes {stable_mosaic.version = 11 : i64} {
  func.func @kernel(%arg0: i32, %arg1: memref<16x32xbf16, #tpu.memory_space<vmem>>, %arg2: memref<32x512xbf16, #tpu.memory_space<vmem>>, %arg3: memref<1x512xf32, #tpu.memory_space<vmem>>, %arg4: memref<512x128xbf16, #tpu.memory_space<vmem>>, %arg5: memref<1x128xf32, #tpu.memory_space<vmem>>, %arg6: memref<128x128xbf16, #tpu.memory_space<vmem>>, %arg7: memref<1x128xf32, #tpu.memory_space<vmem>>, %arg8: memref<128x128xbf16, #tpu.memory_space<vmem>>, %arg9: memref<1x128xf32, #tpu.memory_space<vmem>>, %arg10: memref<16x128xbf16, #tpu.memory_space<vmem>>) attributes {dimension_semantics = [#tpu.dimension_semantics<parallel>], iteration_bounds = array<i64: 1>, scalar_prefetch = 0 : i64, scratch_operands = 0 : i64, tpu.core_type = #tpu.core_type<tc>, window_params = [{transform_indices = @transform_0, window_bounds = array<i64: 16, 32>}, {pipeline_mode = #tpu.pipeline_mode<synchronous>, transform_indices = @transform_1, window_bounds = array<i64: 32, 512>}, {pipeline_mode = #tpu.pipeline_mode<synchronous>, transform_indices = @transform_2, window_bounds = array<i64: 1, 512>}, {pipeline_mode = #tpu.pipeline_mode<synchronous>, transform_indices = @transform_3, window_bounds = array<i64: 512, 128>}, {pipeline_mode = #tpu.pipeline_mode<synchronous>, transform_indices = @transform_4, window_bounds = array<i64: 1, 128>}, {pipeline_mode = #tpu.pipeline_mode<synchronous>, transform_indices = @transform_5, window_bounds = array<i64: 128, 128>}, {pipeline_mode = #tpu.pipeline_mode<synchronous>, transform_indices = @transform_6, window_bounds = array<i64: 1, 128>}, {pipeline_mode = #tpu.pipeline_mode<synchronous>, transform_indices = @transform_7, window_bounds = array<i64: 128, 128>}, {pipeline_mode = #tpu.pipeline_mode<synchronous>, transform_indices = @transform_8, window_bounds = array<i64: 1, 128>}, {transform_indices = @transform_9, window_bounds = array<i64: 16, 128>}]} {
    %c0 = arith.constant 0 : index
    %c0_0 = arith.constant 0 : index
    %0 = vector.load %arg1[%c0, %c0_0] : memref<16x32xbf16, #tpu.memory_space<vmem>>, vector<16x32xbf16>
    %c0_1 = arith.constant 0 : index
    %c0_2 = arith.constant 0 : index
    %1 = vector.load %arg2[%c0_1, %c0_2] : memref<32x512xbf16, #tpu.memory_space<vmem>>, vector<32x512xbf16>
    %cst = arith.constant dense<0.000000e+00> : vector<16x512xf32>
    %2 = tpu.matmul %0, %1, %cst {dimension_numbers = #tpu.dot_dimension_numbers<[1], [0], [0], [1], [0, 0, 1, 1], [], []>} : vector<16x32xbf16>, vector<32x512xbf16>, vector<16x512xf32> -> vector<16x512xf32>
    %c0_3 = arith.constant 0 : index
    %c0_4 = arith.constant 0 : index
    %3 = vector.load %arg3[%c0_3, %c0_4] : memref<1x512xf32, #tpu.memory_space<vmem>>, vector<1x512xf32>
    %4 = vector.broadcast %3 : vector<1x512xf32> to vector<16x512xf32>
    %5 = arith.addf %2, %4 : vector<16x512xf32>
    %cst_5 = arith.constant 0.000000e+00 : f32
    %6 = vector.broadcast %cst_5 : f32 to vector<16x512xf32>
    %7 = arith.maximumf %5, %6 : vector<16x512xf32>
    %8 = arith.truncf %7 : vector<16x512xf32> to vector<16x512xbf16>
    %c0_6 = arith.constant 0 : index
    %c0_7 = arith.constant 0 : index
    %9 = vector.load %arg4[%c0_6, %c0_7] : memref<512x128xbf16, #tpu.memory_space<vmem>>, vector<512x128xbf16>
    %cst_8 = arith.constant dense<0.000000e+00> : vector<16x128xf32>
    %10 = tpu.matmul %8, %9, %cst_8 {dimension_numbers = #tpu.dot_dimension_numbers<[1], [0], [0], [1], [0, 0, 1, 1], [], []>} : vector<16x512xbf16>, vector<512x128xbf16>, vector<16x128xf32> -> vector<16x128xf32>
    %c0_9 = arith.constant 0 : index
    %c0_10 = arith.constant 0 : index
    %11 = vector.load %arg5[%c0_9, %c0_10] : memref<1x128xf32, #tpu.memory_space<vmem>>, vector<1x128xf32>
    %12 = vector.broadcast %11 : vector<1x128xf32> to vector<16x128xf32>
    %13 = arith.addf %10, %12 : vector<16x128xf32>
    %cst_11 = arith.constant 0.000000e+00 : f32
    %14 = vector.broadcast %cst_11 : f32 to vector<16x128xf32>
    %15 = arith.maximumf %13, %14 : vector<16x128xf32>
    %16 = arith.truncf %15 : vector<16x128xf32> to vector<16x128xbf16>
    %c0_12 = arith.constant 0 : index
    %c0_13 = arith.constant 0 : index
    %17 = vector.load %arg6[%c0_12, %c0_13] : memref<128x128xbf16, #tpu.memory_space<vmem>>, vector<128x128xbf16>
    %cst_14 = arith.constant dense<0.000000e+00> : vector<16x128xf32>
    %18 = tpu.matmul %16, %17, %cst_14 {dimension_numbers = #tpu.dot_dimension_numbers<[1], [0], [0], [1], [0, 0, 1, 1], [], []>} : vector<16x128xbf16>, vector<128x128xbf16>, vector<16x128xf32> -> vector<16x128xf32>
    %c0_15 = arith.constant 0 : index
    %c0_16 = arith.constant 0 : index
    %19 = vector.load %arg7[%c0_15, %c0_16] : memref<1x128xf32, #tpu.memory_space<vmem>>, vector<1x128xf32>
    %20 = vector.broadcast %19 : vector<1x128xf32> to vector<16x128xf32>
    %21 = arith.addf %18, %20 : vector<16x128xf32>
    %cst_17 = arith.constant 0.000000e+00 : f32
    %22 = vector.broadcast %cst_17 : f32 to vector<16x128xf32>
    %23 = arith.maximumf %21, %22 : vector<16x128xf32>
    %24 = arith.truncf %23 : vector<16x128xf32> to vector<16x128xbf16>
    %c0_18 = arith.constant 0 : index
    %c0_19 = arith.constant 0 : index
    %25 = vector.load %arg8[%c0_18, %c0_19] : memref<128x128xbf16, #tpu.memory_space<vmem>>, vector<128x128xbf16>
    %cst_20 = arith.constant dense<0.000000e+00> : vector<16x128xf32>
    %26 = tpu.matmul %24, %25, %cst_20 {dimension_numbers = #tpu.dot_dimension_numbers<[1], [0], [0], [1], [0, 0, 1, 1], [], []>} : vector<16x128xbf16>, vector<128x128xbf16>, vector<16x128xf32> -> vector<16x128xf32>
    %c0_21 = arith.constant 0 : index
    %c0_22 = arith.constant 0 : index
    %27 = vector.load %arg9[%c0_21, %c0_22] : memref<1x128xf32, #tpu.memory_space<vmem>>, vector<1x128xf32>
    %28 = vector.broadcast %27 : vector<1x128xf32> to vector<16x128xf32>
    %29 = arith.addf %26, %28 : vector<16x128xf32>
    %cst_23 = arith.constant dense<0xFF800000> : vector<16xf32>
    %30 = vector.multi_reduction <maximumf>, %29, %cst_23 [1] : vector<16x128xf32> to vector<16xf32>
    %31 = vector.shape_cast %30 : vector<16xf32> to vector<16x1xf32>
    %32 = vector.broadcast %31 : vector<16x1xf32> to vector<16x128xf32>
    %33 = arith.subf %29, %32 : vector<16x128xf32>
    %34 = math.exp %33 : vector<16x128xf32>
    %cst_24 = arith.constant dense<0.000000e+00> : vector<16xf32>
    %35 = vector.multi_reduction <add>, %34, %cst_24 [1] : vector<16x128xf32> to vector<16xf32>
    %36 = vector.shape_cast %35 : vector<16xf32> to vector<16x1xf32>
    %37 = math.log %36 : vector<16x1xf32>
    %38 = vector.broadcast %37 : vector<16x1xf32> to vector<16x128xf32>
    %39 = arith.subf %33, %38 : vector<16x128xf32>
    %40 = arith.truncf %39 : vector<16x128xf32> to vector<16x128xbf16>
    %c0_25 = arith.constant 0 : index
    %c0_26 = arith.constant 0 : index
    %41 = vector.load %arg10[%c0_25, %c0_26] : memref<16x128xbf16, #tpu.memory_space<vmem>>, vector<16x128xbf16>
    tpu.vector_store %arg10[%c0_25, %c0_26], %40 {strides = array<i32>} : memref<16x128xbf16, #tpu.memory_space<vmem>>, vector<16x128xbf16>,
    return
  }
  func.func @transform_0(%arg0: i32) -> (i32, i32) {
    %c0_i32 = arith.constant 0 : i32
    %c0_i32_0 = arith.constant 0 : i32
    return %arg0, %c0_i32 : i32, i32
  }
  func.func @transform_1(%arg0: i32) -> (i32, i32) {
    %c0_i32 = arith.constant 0 : i32
    %c0_i32_0 = arith.constant 0 : i32
    %c0_i32_1 = arith.constant 0 : i32
    return %c0_i32, %c0_i32_0 : i32, i32
  }
  func.func @transform_2(%arg0: i32) -> (i32, i32) {
    %c0_i32 = arith.constant 0 : i32
    %c0_i32_0 = arith.constant 0 : i32
    %c0_i32_1 = arith.constant 0 : i32
    return %c0_i32, %c0_i32_0 : i32, i32
  }
  func.func @transform_3(%arg0: i32) -> (i32, i32) {
    %c0_i32 = arith.constant 0 : i32
    %c0_i32_0 = arith.constant 0 : i32
    %c0_i32_1 = arith.constant 0 : i32
    return %c0_i32, %c0_i32_0 : i32, i32
  }
  func.func @transform_4(%arg0: i32) -> (i32, i32) {
    %c0_i32 = arith.constant 0 : i32
    %c0_i32_0 = arith.constant 0 : i32
    %c0_i32_1 = arith.constant 0 : i32
    return %c0_i32, %c0_i32_0 : i32, i32
  }
  func.func @transform_5(%arg0: i32) -> (i32, i32) {
    %c0_i32 = arith.constant 0 : i32
    %c0_i32_0 = arith.constant 0 : i32
    %c0_i32_1 = arith.constant 0 : i32
    return %c0_i32, %c0_i32_0 : i32, i32
  }
  func.func @transform_6(%arg0: i32) -> (i32, i32) {
    %c0_i32 = arith.constant 0 : i32
    %c0_i32_0 = arith.constant 0 : i32
    %c0_i32_1 = arith.constant 0 : i32
    return %c0_i32, %c0_i32_0 : i32, i32
  }
  func.func @transform_7(%arg0: i32) -> (i32, i32) {
    %c0_i32 = arith.constant 0 : i32
    %c0_i32_0 = arith.constant 0 : i32
    %c0_i32_1 = arith.constant 0 : i32
    return %c0_i32, %c0_i32_0 : i32, i32
  }
  func.func @transform_8(%arg0: i32) -> (i32, i32) {
    %c0_i32 = arith.constant 0 : i32
    %c0_i32_0 = arith.constant 0 : i32
    %c0_i32_1 = arith.constant 0 : i32
    return %c0_i32, %c0_i32_0 : i32, i32
  }
  func.func @transform_9(%arg0: i32) -> (i32, i32) {
    %c0_i32 = arith.constant 0 : i32
    %c0_i32_0 = arith.constant 0 : i32
    return %arg0, %c0_i32 : i32, i32
  }
}

</mosaic_0001>

<bundles_post_ra>
// kernel: multiclass_classification_forward.1
= control target key start
LH: loop header
LB: loop body
LE: loop exit
PB: predicated region body
PF: predicated region fallthrough
CT: control target
= control target key end

     0   :  { %14 = vsyncpa [#allocation3], 0  ;;  %s1257_s0 = inlined_call_operand.vmem [shape: bf16[16,32], index: 0, kind: input, shape index: {}]   ;;  %s1258_s1 = inlined_call_operand.hbm [shape: bf16[32,512], index: 1, kind: input, shape index: {}]   ;;  %s1259_s2 = inlined_call_operand.vmem [shape: f32[1,512], index: 2, kind: input, shape index: {}]   ;;  %s1260_s3 = inlined_call_operand.hbm [shape: bf16[512,128], index: 3, kind: input, shape index: {}]   ;;  %s1261_s4 = inlined_call_operand.vmem [shape: f32[1,128], index: 4, kind: input, shape index: {}]   ;;  %s1262_s5 = inlined_call_operand.hbm [shape: bf16[128,128], index: 5, kind: input, shape index: {}]   ;;  %s1263_s6 = inlined_call_operand.vmem [shape: f32[1,128], index: 6, kind: input, shape index: {}]   ;;  %s1264_s7 = inlined_call_operand.hbm [shape: bf16[128,128], index: 7, kind: input, shape index: {}]   ;;  %s1265_s8 = inlined_call_operand.vmem [shape: f32[1,128], index: 8, kind: input, shape index: {}]   ;;  %s1266_s9 = inlined_call_operand.vmem [shape: bf16[16,128], index: 9, kind: output, shape index: {}]  }
   0x1   :  { %15 = vsyncpa [#allocation5], 0  ;;  %s38_s11 = sshll.u32 %s1260_s3, 4  ;;  %s39_s11 = int_to_ptr.hbm [resolvable:$true] %s38_s11 }
   0x2   :  { %16 = vsyncpa [#allocation8], 0  ;;  %s1165_s12 = smov [#allocation4]   ;;  %s23_s16 = sshll.u32 %s1258_s1, 4  ;;  %s24_s16 = int_to_ptr.hbm [resolvable:$true] %s23_s16 }
   0x3   :  { %s40_s13 = sshll.u32 %s1165_s12, 4  ;;  %s1166_s17 = smov 64   ;;  %s41_s13 = int_to_ptr.vmem [resolvable:$true] %s40_s13 }
   0x4   :  { %s1167_s18 = smov 4   ;;  %s1168_s19 = smov [#allocation2]  }
   0x5   :  { %46 = dma.hbm_to_vmem [thread:$0]  %s39_s11, 4096, %s41_s13, [#allocation5], %s1166_s17, %s1166_s17, %s1167_s18  }
   0x6   :  { %s25_s20 = sshll.u32 %s1168_s19, 4  ;;  %s1169_s21 = smov 256   ;;  %s26_s20 = int_to_ptr.vmem [resolvable:$true] %s25_s20 }
   0x7   :  { %s1170_s22 = smov 16   ;;  %s53_s24 = sshll.u32 %s1262_s5, 4  ;;  %s54_s24 = int_to_ptr.hbm [resolvable:$true] %s53_s24 }
   0x8   :  { %31 = dma.hbm_to_vmem [thread:$0]  %s24_s16, 1024, %s26_s20, [#allocation3], %s1169_s21, %s1169_s21, %s1170_s22  }
   0x9   :  { %s1171_s25 = smov [#allocation6]   ;;  %s68_s28 = sshll.u32 %s1264_s7, 4  ;;  %s69_s28 = int_to_ptr.hbm [resolvable:$true] %s68_s28 }
   0xa   :  { %s55_s26 = sshll.u32 %s1171_s25, 4  ;;  %s1172_s29 = smov [#allocation7]   ;;  %s56_s26 = int_to_ptr.vmem [resolvable:$true] %s55_s26 }
   0xb   :  { %61 = dma.hbm_to_vmem [thread:$0]  %s54_s24, 1024, %s56_s26, [#allocation5], %s1166_s17, %s1166_s17, %s1167_s18  }
   0xc   :  { %s70_s30 = sshll.u32 %s1172_s29, 4  ;;  %s71_s30 = int_to_ptr.vmem [resolvable:$true] %s70_s30 }
   0xd   :  { %76 = dma.hbm_to_vmem [thread:$0]  %s69_s28, 1024, %s71_s30, [#allocation8], %s1166_s17, %s1166_s17, %s1167_s18  }
   0xe   :  { %1159 = dma.done.wait [#allocation3], 1024  }
   0xf   :  { %1160 = vsyncadd [#allocation3], 4294966272 }
  0x10   :  { %1161 = dma.done.wait [#allocation5], 5120  }
  0x11   :  { %1162 = vsyncadd [#allocation5], 4294962176 }
  0x12   :  { %1163 = dma.done.wait [#allocation8], 1024  }
  0x13   :  { %1164 = vsyncadd [#allocation8], 4294966272  ;;  %v772_v0 = vld [vmem:[#allocation2 + $0x20] sm:$0xf]  ;;  %v989_v1 = vld [vmem:[#allocation2 + $0x2c] sm:$0xf0] }
  0x14   :  { %v987_v2 = vld [vmem:[#allocation2 + $0x24] sm:$0xf]  ;;  %v773_v3 = vor.u32 %v989_v1, %v772_v0  ;;  %v774_v4 = vld [vmem:[#allocation2 + $0x30] sm:$0xf0]  ;;  %v756_v5 = vld [vmem:[#allocation2] sm:$0xf] }
  0x15   :  { %v985_v6 = vld [vmem:[#allocation2 + $0xc] sm:$0xf0]  ;;  %v777_v7 = vor.u32 %v987_v2, %v774_v4  ;;  %v983_v8 = vld [vmem:[#allocation2 + $0x4] sm:$0xf]  ;;  %v758_v9 = vld [vmem:[#allocation2 + $0x10] sm:$0xf0] }
  0x16   :  { %171 = vmatpush.bf16.msra.mxu2 %v773_v3  ;;  %v757_v10 = vor.u32 %v985_v6, %v756_v5  ;;  %v780_v11 = vld [vmem:[#allocation2 + $0x28] sm:$0xf]  ;;  %v990_v12 = vld [vmem:[#allocation2 + $0x34] sm:$0xf0]  ;;  %v988_v13 = vld [vmem:[#allocation2 + $0x2c] sm:$0xf]  ;;  %v761_v14 = vor.u32 %v983_v8, %v758_v9 }
  0x17   :  { %185 = vmatpush.bf16.msra.mxu3 %v777_v7  ;;  %v982_v15 = vld [vmem:[%s1257_s0] sm:$0xff]  ;;  %v781_v16 = vor.u32 %v990_v12, %v780_v11  ;;  %v782_v17 = vld [vmem:[#allocation2 + $0x38] sm:$0xf0]  ;;  %v764_v19 = vld [vmem:[#allocation2 + $0x8] sm:$0xf]  ;;  %vm161_vm0 = vcmask 261120  }
  0x18   :  { %v785_v18 = vor.u32 %v988_v13, %v782_v17  ;;  %v986_v20 = vld [vmem:[#allocation2 + $0x14] sm:$0xf0]  ;;  %v984_v22 = vld [vmem:[#allocation2 + $0xc] sm:$0xf]  ;;  %v766_v23 = vld [vmem:[#allocation2 + $0x18] sm:$0xf0] }
  0x19   :  { %v998_v21 = vld [vmem:[#allocation4 + $0x38] sm:$0xff]  ;;  %v997_v25 = vld [vmem:[#allocation4 + $0x30] sm:$0xff]  ;;  %v765_v26 = vor.u32 %v986_v20, %v764_v19  ;;  %v769_v27 = vor.u32 %v984_v22, %v766_v23  ;;  %v996_v29 = vld [vmem:[#allocation4 + $0x28] sm:$0xff] }
  0x1a   :  { %v1006_v24 = vld [vmem:[#allocation4 + $0x78] sm:$0xff]  ;;  %172 = vmatpush.bf16.msra.mxu2 %v757_v10  ;;  %493 = vmatpush.bf16.msra.mxu0 %v998_v21  ;;  %v1005_v28 = vld [vmem:[#allocation4 + $0x70] sm:$0xff]  ;;  %v1004_v30 = vld [vmem:[#allocation4 + $0x68] sm:$0xff] }
  0x1b   :  { %186 = vmatpush.bf16.msra.mxu3 %v761_v14  ;;  %507 = vmatpush.bf16.msra.mxu1 %v1006_v24  ;;  %v995_v31 = vld [vmem:[#allocation4 + $0x20] sm:$0xff]  ;;  %v994_v33 = vld [vmem:[#allocation4 + $0x18] sm:$0xff]  ;;  %v993_v37 = vld [vmem:[#allocation4 + $0x10] sm:$0xff] }
  0x1c   :  { %v1003_v32 = vld [vmem:[#allocation4 + $0x60] sm:$0xff]  ;;  %v1002_v34 = vld [vmem:[#allocation4 + $0x58] sm:$0xff]  ;;  %v1001_v38 = vld [vmem:[#allocation4 + $0x50] sm:$0xff] }
  0x1d   :  { %786 = vmatmul.msk.bf16.vlgmr.msra.gmra.mxu2 %vm161_vm0, %v982_v15  ;;  %v1014_v35 = vld [vmem:[#allocation4 + $0xb8] sm:$0xff]  ;;  %v1013_v39 = vld [vmem:[#allocation4 + $0xb0] sm:$0xff]  ;;  %v992_v41 = vld [vmem:[#allocation4 + $0x8] sm:$0xff] }
  0x1e   :  { %199 = vmatpush.bf16.msrb.mxu2 %v781_v16  ;;  %787 = vmatmul.msk.bf16.vlgmr.msra.gmra.mxu3 %vm161_vm0, %v982_v15  ;;  %v1022_v36 = vld [vmem:[#allocation4 + $0xf8] sm:$0xff]  ;;  %v1021_v40 = vld [vmem:[#allocation4 + $0xf0] sm:$0xff]  ;;  %v1000_v42 = vld [vmem:[#allocation4 + $0x48] sm:$0xff] }
  0x1f   :  { %213 = vmatpush.bf16.msrb.mxu3 %v785_v18  ;;  %494 = vmatpush.bf16.msra.mxu0 %v997_v25  ;;  %v1012_v43 = vld [vmem:[#allocation4 + $0xa8] sm:$0xff]  ;;  %v991_v45 = vld [vmem:[#allocation4] sm:$0xff]  ;;  %v1010_v49 = vld [vmem:[#allocation4 + $0x98] sm:$0xff] }
  0x20   :  { %508 = vmatpush.bf16.msra.mxu1 %v1005_v28  ;;  %v1020_v44 = vld [vmem:[#allocation4 + $0xe8] sm:$0xff]  ;;  %v999_v46 = vld [vmem:[#allocation4 + $0x40] sm:$0xff]  ;;  %v1018_v50 = vld [vmem:[#allocation4 + $0xd8] sm:$0xff] }
  0x21   :  { %v1011_v47 = vld [vmem:[#allocation4 + $0xa0] sm:$0xff]  ;;  %v1009_v51 = vld [vmem:[#allocation4 + $0x90] sm:$0xff]  ;;  %v1008_v53 = vld [vmem:[#allocation4 + $0x88] sm:$0xff] }
  0x22   :  { %200 = vmatpush.bf16.msrb.mxu2 %v765_v26  ;;  %v1019_v48 = vld [vmem:[#allocation4 + $0xe0] sm:$0xff]  ;;  %v1017_v52 = vld [vmem:[#allocation4 + $0xd0] sm:$0xff]  ;;  %v1016_v54 = vld [vmem:[#allocation4 + $0xc8] sm:$0xff] }
  0x23   :  { %214 = vmatpush.bf16.msrb.mxu3 %v769_v27  ;;  %495 = vmatpush.bf16.msra.mxu0 %v996_v29  ;;  %v1007_v55 = vld [vmem:[#allocation4 + $0x80] sm:$0xff]  ;;  %v1030_v26 = vld [vmem:[#allocation6 + $0x38] sm:$0xff]  ;;  %v1029_v27 = vld [vmem:[#allocation6 + $0x30] sm:$0xff] }
  0x24   :  { %509 = vmatpush.bf16.msra.mxu1 %v1004_v30  ;;  %v1015_v56 = vld [vmem:[#allocation4 + $0xc0] sm:$0xff]  ;;  %v1028_v28 = vld [vmem:[#allocation6 + $0x28] sm:$0xff]  ;;  %v1026_v30 = vld [vmem:[#allocation6 + $0x18] sm:$0xff] }
  0x25   :  { %v106_v57 = vld [vmem:[%s1259_s2] sm:$0xf] }
  0x26   :  { %521 = vmatpush.bf16.msra.mxu2 %v1014_v35  ;;  %v108_v60 = vperm.slane %v106_v57, 0  ;;  %v109_v61 = vperm.slane %v106_v57, 1  ;;  %v110_v12 = vperm.slane %v106_v57, 2  ;;  %v111_v13 = vperm.slane %v106_v57, 3  ;;  %v1027_v29 = vld [vmem:[#allocation6 + $0x20] sm:$0xff]  ;;  %v1037_v35 = vld [vmem:[#allocation7 + $0x30] sm:$0xff] }
  0x27   :  { %496 = vmatpush.bf16.msra.mxu0 %v995_v31  ;;  %535 = vmatpush.bf16.msra.mxu3 %v1022_v36  ;;  %v1025_v31 = vld [vmem:[#allocation6 + $0x10] sm:$0xff] }
  0x28   :  { %510 = vmatpush.bf16.msra.mxu1 %v1003_v32  ;;  %v1024_v32 = vld [vmem:[#allocation6 + $0x8] sm:$0xff] }
  0x2a   :  { %522 = vmatpush.bf16.msra.mxu2 %v1013_v39  ;;  %v1035_v39 = vld [vmem:[#allocation7 + $0x20] sm:$0xff] }
  0x2b   :  { %497 = vmatpush.bf16.msra.mxu0 %v994_v33  ;;  %536 = vmatpush.bf16.msra.mxu3 %v1021_v40  ;;  %v1023_v33 = vld [vmem:[#allocation6] sm:$0xff] }
  0x2c   :  { %511 = vmatpush.bf16.msra.mxu1 %v1002_v34  ;;  %v1038_v34 = vld [vmem:[#allocation7 + $0x38] sm:$0xff] }
  0x2d   :  { %788 = vmatmul.msk.bf16.vlgmr.msrb.gmra.mxu2 %vm161_vm0, %v982_v15 }
  0x2e   :  { %789 = vmatmul.msk.bf16.vlgmr.msrb.gmra.mxu3 %vm161_vm0, %v982_v15  ;;  %523 = vmatpush.bf16.msra.mxu2 %v1012_v43 }
  0x2f   :  { %498 = vmatpush.bf16.msra.mxu0 %v993_v37  ;;  %537 = vmatpush.bf16.msra.mxu3 %v1020_v44  ;;  %v1036_v37 = vld [vmem:[#allocation7 + $0x28] sm:$0xff] }
  0x30   :  { %512 = vmatpush.bf16.msra.mxu1 %v1001_v38  ;;  %v1052_v38 = vld [vmem:[%s1261_s4] ss:$0 sm:$0xff] }
  0x32   :  { %524 = vmatpush.bf16.msra.mxu2 %v1011_v47 }
  0x33   :  { %499 = vmatpush.bf16.msra.mxu0 %v992_v41  ;;  %538 = vmatpush.bf16.msra.mxu3 %v1019_v48 }
  0x34   :  { %513 = vmatpush.bf16.msra.mxu1 %v1000_v42 }
  0x36   :  { %525 = vmatpush.bf16.msra.mxu2 %v1010_v49 }
  0x37   :  { %500 = vmatpush.bf16.msra.mxu0 %v991_v45  ;;  %539 = vmatpush.bf16.msra.mxu3 %v1018_v50 }
  0x38   :  { %514 = vmatpush.bf16.msra.mxu1 %v999_v46 }
  0x3a   :  { %526 = vmatpush.bf16.msra.mxu2 %v1009_v51 }
  0x3b   :  { %540 = vmatpush.bf16.msra.mxu3 %v1017_v52  ;;  %620 = vmatpush.bf16.msrb.mxu0 %v1030_v26 }
  0x3c   :  { %705 = vmatpush.bf16.msrb.mxu1 %v1038_v34 }
  0x3e   :  { %527 = vmatpush.bf16.msra.mxu2 %v1008_v53 }
  0x3f   :  { %541 = vmatpush.bf16.msra.mxu3 %v1016_v54  ;;  %621 = vmatpush.bf16.msrb.mxu0 %v1029_v27 }
  0x40   :  { %706 = vmatpush.bf16.msrb.mxu1 %v1037_v35 }
  0x42   :  { %528 = vmatpush.bf16.msra.mxu2 %v1007_v55 }
  0x43   :  { %542 = vmatpush.bf16.msra.mxu3 %v1015_v56  ;;  %622 = vmatpush.bf16.msrb.mxu0 %v1028_v28 }
  0x44   :  { %707 = vmatpush.bf16.msrb.mxu1 %v1036_v37 }
  0x47   :  { %623 = vmatpush.bf16.msrb.mxu0 %v1027_v29 }
  0x48   :  { %708 = vmatpush.bf16.msrb.mxu1 %v1035_v39 }
  0x4b   :  { %624 = vmatpush.bf16.msrb.mxu0 %v1026_v30 }
  0x4f   :  { %625 = vmatpush.bf16.msrb.mxu0 %v1025_v31 }
  0x53   :  { %626 = vmatpush.bf16.msrb.mxu0 %v1024_v32 }
  0x57   :  { %627 = vmatpush.bf16.msrb.mxu0 %v1023_v33 }
  0xa0   :  { %v174_v58 = vpop.f32.mrf.mxu2 }
  0xa1   :  { %v188_v59 = vpop.f32.mrf.mxu3  ;;  %v175_v62 = vadd.f32 %v174_v58, %v108_v60  ;;  %v1034_v58 = vld [vmem:[#allocation7 + $0x18] sm:$0xff] }
  0xa2   :  { %v189_v63 = vadd.f32 %v188_v59, %v109_v61  ;;  %709 = vmatpush.bf16.msrb.mxu1 %v1034_v58  ;;  %v1033_v59 = vld [vmem:[#allocation7 + $0x10] sm:$0xff] }
  0xa3   :  { %v221_v4 = vmax.f32 %v175_v62, 0.0 }
  0xa4   :  { %v222_v6 = vmax.f32 %v189_v63, 0.0  ;;  %v1053_v63 = vld [vmem:[%s1263_s6] ss:$0 sm:$0xff] }
  0xa6   :  { %710 = vmatpush.bf16.msrb.mxu1 %v1033_v59 }
  0xa8   :  { %v176_v0 = vpop.f32.mrf.mxu2 }
  0xa9   :  { %v177_v1 = vadd.f32 %v176_v0, %v108_v60  ;;  %v190_v2 = vpop.f32.mrf.mxu3  ;;  %v1032_v60 = vld [vmem:[#allocation7 + $0x8] sm:$0xff] }
  0xaa   :  { %v191_v3 = vadd.f32 %v190_v2, %v109_v61  ;;  %711 = vmatpush.bf16.msrb.mxu1 %v1032_v60  ;;  %v1031_v61 = vld [vmem:[#allocation7] sm:$0xff] }
  0xab   :  { %v225_v5 = vmax.f32 %v177_v1, 0.0 }
  0xac   :  { %v226_v7 = vmax.f32 %v191_v3, 0.0 }
  0xad   :  { %v229_v8 = vpack.c.bf16 %v225_v5, %v221_v4 }
  0xae   :  { %v230_v9 = vpack.c.bf16 %v226_v7, %v222_v6  ;;  %712 = vmatpush.bf16.msrb.mxu1 %v1031_v61  ;;  %v1054_v6 = vld [vmem:[%s1265_s8] ss:$0 sm:$0xff] }
  0xaf   :  { %501 = vmatmul.bf16.vlgmr.msra.gmra.mxu0 %v229_v8 }
  0xb0   :  { %515 = vmatmul.bf16.vlgmr.msra.gmra.mxu1 %v230_v9  ;;  %v202_v10 = vpop.f32.mrf.mxu2 }
  0xb1   :  { %v216_v11 = vpop.f32.mrf.mxu3  ;;  %v203_v14 = vadd.f32 %v202_v10, %v110_v12 }
  0xb2   :  { %v217_v15 = vadd.f32 %v216_v11, %v111_v13 }
  0xb3   :  { %v223_v20 = vmax.f32 %v203_v14, 0.0 }
  0xb4   :  { %v224_v22 = vmax.f32 %v217_v15, 0.0 }
  0xb8   :  { %v204_v16 = vpop.f32.mrf.mxu2 }
  0xb9   :  { %v205_v17 = vadd.f32 %v204_v16, %v110_v12  ;;  %v218_v18 = vpop.f32.mrf.mxu3 }
  0xba   :  { %v219_v19 = vadd.f32 %v218_v18, %v111_v13 }
  0xbb   :  { %v227_v21 = vmax.f32 %v205_v17, 0.0 }
  0xbc   :  { %v228_v23 = vmax.f32 %v219_v19, 0.0 }
  0xbd   :  { %v231_v24 = vpack.c.bf16 %v227_v21, %v223_v20 }
  0xbe   :  { %v232_v25 = vpack.c.bf16 %v228_v23, %v224_v22 }
  0xbf   :  { %529 = vmatmul.bf16.vlgmr.msra.gmra.mxu2 %v231_v24 }
  0xc0   :  { %543 = vmatmul.bf16.vlgmr.msra.gmra.mxu3 %v232_v25 }
 0x12c   :  { %v502_v36 = vpop.f32.mrf.mxu0 }
 0x12d   :  { %v516_v40 = vpop.f32.mrf.mxu1  ;;  %v503_v41 = vadd.f32 %v1052_v38, %v502_v36 }
 0x12f   :  { %v517_v45 = vadd.f32 %v516_v40, %v503_v41 }
 0x134   :  { %v504_v42 = vpop.f32.mrf.mxu0 }
 0x135   :  { %v505_v46 = vadd.f32 %v1052_v38, %v504_v42  ;;  %v518_v48 = vpop.f32.mrf.mxu1 }
 0x137   :  { %v519_v49 = vadd.f32 %v518_v48, %v505_v46 }
 0x142   :  { %v530_v43 = vpop.f32.mrf.mxu2 }
 0x143   :  { %v544_v44 = vpop.f32.mrf.mxu3  ;;  %v531_v47 = vadd.f32 %v530_v43, %v517_v45 }
 0x145   :  { %v545_v51 = vadd.f32 %v544_v44, %v531_v47 }
 0x147   :  { %v549_v55 = vmax.f32 %v545_v51, 0.0 }
 0x14a   :  { %v532_v50 = vpop.f32.mrf.mxu2 }
 0x14b   :  { %v533_v52 = vadd.f32 %v532_v50, %v519_v49  ;;  %v546_v53 = vpop.f32.mrf.mxu3 }
 0x14d   :  { %v547_v54 = vadd.f32 %v546_v53, %v533_v52 }
 0x14f   :  { %v550_v56 = vmax.f32 %v547_v54, 0.0 }
 0x151   :  { %v551_v57 = vpack.c.bf16 %v550_v56, %v549_v55 }
 0x153   :  { %628 = vmatmul.bf16.vlgmr.msrb.gmra.mxu0 %v551_v57 }
 0x1d0   :  { %v629_v62 = vpop.f32.mrf.mxu0 }
 0x1d1   :  { %v630_v0 = vadd.f32 %v1053_v63, %v629_v62 }
 0x1d3   :  { %v634_v3 = vmax.f32 %v630_v0, 0.0 }
 0x1d8   :  { %v631_v1 = vpop.f32.mrf.mxu0 }
 0x1d9   :  { %v632_v2 = vadd.f32 %v1053_v63, %v631_v1 }
 0x1db   :  { %v635_v4 = vmax.f32 %v632_v2, 0.0 }
 0x1dd   :  { %v636_v5 = vpack.c.bf16 %v635_v4, %v634_v3 }
 0x1df   :  { %713 = vmatmul.bf16.vlgmr.msrb.gmra.mxu1 %v636_v5 }
 0x25c   :  { %v714_v7 = vpop.f32.mrf.mxu1 }
 0x25d   :  { %v715_v8 = vadd.f32 %v1054_v6, %v714_v7 }
 0x25f   :  { %719 = vmax.xlane.f32.xlu0 %v715_v8 }
 0x264   :  { %v716_v9 = vpop.f32.mrf.mxu1 }
 0x265   :  { %v717_v10 = vadd.f32 %v1054_v6, %v716_v9 }
 0x267   :  { %721 = vmax.xlane.f32.xlu0 %v717_v10 }
 0x2d2   :  { %v720_v11 = vpop.xlane.xlu0 %719 }
 0x2d3   :  { %v723_v12 = vsub.f32 %v715_v8, %v720_v11 }
 0x2d5   :  { %v725_v13 = vmul.f32 1.442695, %v723_v12 }
 0x2d7   :  { %1055 = vpow2.f32 %v725_v13 }
 0x2da   :  { %v722_v14 = vpop.xlane.xlu0 %721 }
 0x2db   :  { %v724_v15 = vsub.f32 %v717_v10, %v722_v14 }
 0x2dd   :  { %v1056_v16 = vpop.eup %1055  ;;  %v727_v17 = vmul.f32 1.442695, %v724_v15 }
 0x2de   :  { %729 = vadd.xlane.f32.xlu1 %v1056_v16 }
 0x2df   :  { %1057 = vpow2.f32 %v727_v17 }
 0x2e5   :  { %v1058_v18 = vpop.eup %1057 }
 0x2e6   :  { %731 = vadd.xlane.f32.xlu1 %v1058_v18 }
 0x351   :  { %v730_v19 = vpop.xlane.xlu1 %729 }
 0x352   :  { %1059 = vlog2.f32 %v730_v19 }
 0x358   :  { %v1060_v21 = vpop.eup %1059 }
 0x359   :  { %v732_v20 = vpop.xlane.xlu1 %731  ;;  %v734_v22 = vmul.f32 0.6931472, %v1060_v21 }
 0x35a   :  { %1061 = vlog2.f32 %v732_v20 }
 0x35b   :  { %v737_v25 = vsub.f32 %v723_v12, %v734_v22 }
 0x360   :  { %v1062_v23 = vpop.eup %1061 }
 0x361   :  { %v736_v24 = vmul.f32 0.6931472, %v1062_v23 }
 0x363   :  { %v738_v26 = vsub.f32 %v724_v15, %v736_v24 }
 0x365   :  { %v1042_v27 = vpack.c.bf16 %v738_v26, %v737_v25 }
 0x367   :  { %1043 = vst [vmem:[%s1266_s9] sm:$0xff] %v1042_v27  }
 0x368   :  { %747 = vsyncpa [#allocation3], 1 }
 0x369   :  { %748 = vsyncpa [#allocation5], 1 }
 0x36a   :  { %749 = vsyncpa [#allocation8], 1 }

</bundles_post_ra>
